<compile_context>
chip_gen: v5e
topology: v5e:2x2
jax: 0.10.0
libtpu: 0.0.40
codegen_flags: <defaults>
</compile_context>

<pallas_src>
import jax
import jax.numpy as jnp
from jax.experimental import pallas as pl
from jax.experimental.pallas import tpu as pltpu

LANE = 128                 # TPU lane width (last block dim)
SUBLANE = 8                # f32 sublane granule (second-to-last block dim granule)
DEFAULT_BLOCK_ROWS = 2048  # rows of 128 batch elems per grid step:
                           #   2 MiB in + 1 MiB out per step, ~6 MiB double-buffered VMEM


def _sigmoid(z):
    # EUP-pinned sigmoid: tanh uses the otherwise-idle EUP slot and avoids a
    # full-precision VALU divide.  Mathematically identical to 1/(1+exp(-z)).
    return 0.5 * jnp.tanh(0.5 * z) + 0.5


def mlp_kernel(params_ref, x_ref, o_ref):
    """One grid step: (2, block_r, 128) input feature planes -> (block_r, 128) outputs.

    Batch spans sublanes AND lanes, so all vector work runs on dense (8,128) vregs.

    params_ref (SMEM, shape (9,), PyTorch nn.Linear row-major order):
      [0..3] fc1.weight (w1[0,0], w1[0,1], w1[1,0], w1[1,1])
      [4..5] fc1.bias
      [6..7] fc2.weight (w2[0,0], w2[0,1])
      [8]    fc2.bias
    """
    x0 = x_ref[0]          # (block_r, 128): input feature 0 for block_r*128 batch elems
    x1 = x_ref[1]          # (block_r, 128): input feature 1

    w1_00 = params_ref[0]
    w1_01 = params_ref[1]
    w1_10 = params_ref[2]
    w1_11 = params_ref[3]
    b1_0 = params_ref[4]
    b1_1 = params_ref[5]
    w2_0 = params_ref[6]
    w2_1 = params_ref[7]
    b2_0 = params_ref[8]

    # fc1 + sigmoid: hand-unrolled K=2 contraction on the VPU (no MXU for 4 MACs).
    h0 = _sigmoid(x0 * w1_00 + x1 * w1_01 + b1_0)
    h1 = _sigmoid(x0 * w1_10 + x1 * w1_11 + b1_1)

    # fc2 + sigmoid: dense, unmasked (block_r, 128) store.
    o_ref[...] = _sigmoid(h0 * w2_0 + h1 * w2_1 + b2_0)
    # TODO(synk): the PyTorch forward print()s every intermediate activation tensor;
    # printing full tensors has no clean Pallas equivalent, so it is omitted here.


def neural_net_forward(x, w1, b1, w2, b2, *, block_rows=DEFAULT_BLOCK_ROWS):
    """x: (B, 2) float32.  PyTorch parameter layout: w1 (2,2), b1 (2,), w2 (1,2), b2 (1,).

    Returns (B, 1) float32, identical to NeuralNet.forward(x).
    """
    x = jnp.asarray(x, jnp.float32)
    B = x.shape[0]

    # Tile the batch as rows of 128 lanes; block_r rows (multiple of 8 sublanes) per step.
    rows_needed = pl.cdiv(B, LANE)
    block_r = max(SUBLANE, min(block_rows, pl.cdiv(rows_needed, SUBLANE) * SUBLANE))
    rows = pl.cdiv(rows_needed, block_r) * block_r
    b_pad = rows * LANE

    # Pad the batch to the tile grid and split the two interleaved input features into
    # dense (rows, 128) planes; XLA fuses the pad+transpose into one copy pass.
    # TODO(synk): a fully zero-copy interleaved-(B,2) input would need an in-kernel
    # stride-2 lane de-interleave, which has no robust Mosaic lowering today; this
    # plane relayout is the single remaining non-kernel HBM pass.
    x_pad = jnp.pad(x, ((0, b_pad - B), (0, 0)))
    planes = x_pad.reshape(rows, LANE, 2).transpose(2, 0, 1)   # (2, rows, 128)

    # All 9 parameters as one flat SMEM-resident vector (single tiny DMA per call).
    params = jnp.concatenate([
        jnp.ravel(jnp.asarray(w1, jnp.float32)),
        jnp.ravel(jnp.asarray(b1, jnp.float32)),
        jnp.ravel(jnp.asarray(w2, jnp.float32)),
        jnp.ravel(jnp.asarray(b2, jnp.float32)),
    ])  # (9,)

    out_planes = pl.pallas_call(
        mlp_kernel,
        out_shape=jax.ShapeDtypeStruct((rows, LANE), jnp.float32),
        grid=(rows // block_r,),
        in_specs=[
            pl.BlockSpec(memory_space=pltpu.MemorySpace.SMEM),       # params (whole array)
            pl.BlockSpec((2, block_r, LANE), lambda i: (0, i, 0)),   # x feature-plane tile
        ],
        out_specs=pl.BlockSpec((block_r, LANE), lambda i: (i, 0)),
        compiler_params=pltpu.CompilerParams(
            # "parallel" lets the batch grid shard across v7x's 2 TensorCores
            # (harmless no-op on single-TC v5e/v6e).
            dimension_semantics=("parallel",),
            vmem_limit_bytes=32 * 1024 * 1024,
        ),
    )(params, planes)

    return out_planes.reshape(b_pad, 1)[:B]   # back to PyTorch layout (B, 1)


if __name__ == "__main__":
    key = jax.random.PRNGKey(0)
    kx, k1, k2, k3, k4 = jax.random.split(key, 5)

    # PyTorch nn.Linear shapes: W (out, in), b (out,)
    w1 = jax.random.uniform(k1, (2, 2), minval=-0.7, maxval=0.7, dtype=jnp.float32)
    b1 = jax.random.uniform(k2, (2,), minval=-0.7, maxval=0.7, dtype=jnp.float32)
    w2 = jax.random.uniform(k3, (1, 2), minval=-0.7, maxval=0.7, dtype=jnp.float32)
    b2 = jax.random.uniform(k4, (1,), minval=-0.7, maxval=0.7, dtype=jnp.float32)

    def reference(xv):
        return jax.nn.sigmoid(jax.nn.sigmoid(xv @ w1.T + b1) @ w2.T + b2)

    # Small batch consistent with the 2 -> 2 -> 1 module.
    B = 8
    x = jax.random.normal(kx, (B, 2), dtype=jnp.float32)
    out = jax.block_until_ready(neural_net_forward(x, w1, b1, w2, b2))
    assert out.shape == (B, 1)
    assert jnp.allclose(out, reference(x), atol=1e-5), "mismatch vs reference (B=8)"

    # Exercise the multi-step (grid > 1) pipelined path with an unaligned batch size.
    B2 = 2500
    x2 = jax.random.normal(kx, (B2, 2), dtype=jnp.float32)
    out2 = jax.block_until_ready(neural_net_forward(x2, w1, b1, w2, b2, block_rows=8))
    assert out2.shape == (B2, 1)
    assert jnp.allclose(out2, reference(x2), atol=1e-5), "mismatch vs reference (B=2500)"

    print("KERNEL_OK")
</pallas_src>

<mosaic_0001>
module attributes {stable_mosaic.version = 11 : i64} {
  func.func @mlp_kernel(%arg0: i32, %arg1: memref<9xf32, #tpu.memory_space<smem>>, %arg2: memref<2x8x128xf32, #tpu.memory_space<vmem>>, %arg3: memref<8x128xf32, #tpu.memory_space<vmem>>) attributes {dimension_semantics = [#tpu.dimension_semantics<parallel>], iteration_bounds = array<i64: 1>, scalar_prefetch = 0 : i64, scratch_operands = 0 : i64, tpu.core_type = #tpu.core_type<tc>, window_params = [{transform_indices = @transform_0, window_bounds = array<i64: 9>}, {transform_indices = @transform_1, window_bounds = array<i64: 2, 8, 128>}, {transform_indices = @transform_2, window_bounds = array<i64: 8, 128>}]} {
    %c0 = arith.constant 0 : index
    %c0_0 = arith.constant 0 : index
    %c0_1 = arith.constant 0 : index
    %0 = vector.load %arg2[%c0, %c0_0, %c0_1] : memref<2x8x128xf32, #tpu.memory_space<vmem>>, vector<1x8x128xf32>
    %1 = vector.shape_cast %0 : vector<1x8x128xf32> to vector<8x128xf32>
    %c1 = arith.constant 1 : index
    %c0_2 = arith.constant 0 : index
    %c0_3 = arith.constant 0 : index
    %2 = vector.load %arg2[%c1, %c0_2, %c0_3] : memref<2x8x128xf32, #tpu.memory_space<vmem>>, vector<1x8x128xf32>
    %3 = vector.shape_cast %2 : vector<1x8x128xf32> to vector<8x128xf32>
    %c0_4 = arith.constant 0 : index
    %4 = memref.load %arg1[%c0_4] : memref<9xf32, #tpu.memory_space<smem>>
    %c1_5 = arith.constant 1 : index
    %5 = memref.load %arg1[%c1_5] : memref<9xf32, #tpu.memory_space<smem>>
    %c2 = arith.constant 2 : index
    %6 = memref.load %arg1[%c2] : memref<9xf32, #tpu.memory_space<smem>>
    %c3 = arith.constant 3 : index
    %7 = memref.load %arg1[%c3] : memref<9xf32, #tpu.memory_space<smem>>
    %c4 = arith.constant 4 : index
    %8 = memref.load %arg1[%c4] : memref<9xf32, #tpu.memory_space<smem>>
    %c5 = arith.constant 5 : index
    %9 = memref.load %arg1[%c5] : memref<9xf32, #tpu.memory_space<smem>>
    %c6 = arith.constant 6 : index
    %10 = memref.load %arg1[%c6] : memref<9xf32, #tpu.memory_space<smem>>
    %c7 = arith.constant 7 : index
    %11 = memref.load %arg1[%c7] : memref<9xf32, #tpu.memory_space<smem>>
    %c8 = arith.constant 8 : index
    %12 = memref.load %arg1[%c8] : memref<9xf32, #tpu.memory_space<smem>>
    %13 = vector.broadcast %4 : f32 to vector<8x128xf32>
    %14 = arith.mulf %1, %13 : vector<8x128xf32>
    %15 = vector.broadcast %5 : f32 to vector<8x128xf32>
    %16 = arith.mulf %3, %15 : vector<8x128xf32>
    %17 = arith.addf %14, %16 : vector<8x128xf32>
    %18 = vector.broadcast %8 : f32 to vector<8x128xf32>
    %19 = arith.addf %17, %18 : vector<8x128xf32>
    %cst = arith.constant 5.000000e-01 : f32
    %20 = vector.broadcast %cst : f32 to vector<8x128xf32>
    %21 = arith.mulf %20, %19 : vector<8x128xf32>
    %22 = math.tanh %21 : vector<8x128xf32>
    %cst_6 = arith.constant 5.000000e-01 : f32
    %23 = vector.broadcast %cst_6 : f32 to vector<8x128xf32>
    %24 = arith.mulf %23, %22 : vector<8x128xf32>
    %cst_7 = arith.constant 5.000000e-01 : f32
    %25 = vector.broadcast %cst_7 : f32 to vector<8x128xf32>
    %26 = arith.addf %24, %25 : vector<8x128xf32>
    %27 = vector.broadcast %6 : f32 to vector<8x128xf32>
    %28 = arith.mulf %1, %27 : vector<8x128xf32>
    %29 = vector.broadcast %7 : f32 to vector<8x128xf32>
    %30 = arith.mulf %3, %29 : vector<8x128xf32>
    %31 = arith.addf %28, %30 : vector<8x128xf32>
    %32 = vector.broadcast %9 : f32 to vector<8x128xf32>
    %33 = arith.addf %31, %32 : vector<8x128xf32>
    %cst_8 = arith.constant 5.000000e-01 : f32
    %34 = vector.broadcast %cst_8 : f32 to vector<8x128xf32>
    %35 = arith.mulf %34, %33 : vector<8x128xf32>
    %36 = math.tanh %35 : vector<8x128xf32>
    %cst_9 = arith.constant 5.000000e-01 : f32
    %37 = vector.broadcast %cst_9 : f32 to vector<8x128xf32>
    %38 = arith.mulf %37, %36 : vector<8x128xf32>
    %cst_10 = arith.constant 5.000000e-01 : f32
    %39 = vector.broadcast %cst_10 : f32 to vector<8x128xf32>
    %40 = arith.addf %38, %39 : vector<8x128xf32>
    %41 = vector.broadcast %10 : f32 to vector<8x128xf32>
    %42 = arith.mulf %26, %41 : vector<8x128xf32>
    %43 = vector.broadcast %11 : f32 to vector<8x128xf32>
    %44 = arith.mulf %40, %43 : vector<8x128xf32>
    %45 = arith.addf %42, %44 : vector<8x128xf32>
    %46 = vector.broadcast %12 : f32 to vector<8x128xf32>
    %47 = arith.addf %45, %46 : vector<8x128xf32>
    %cst_11 = arith.constant 5.000000e-01 : f32
    %48 = vector.broadcast %cst_11 : f32 to vector<8x128xf32>
    %49 = arith.mulf %48, %47 : vector<8x128xf32>
    %50 = math.tanh %49 : vector<8x128xf32>
    %cst_12 = arith.constant 5.000000e-01 : f32
    %51 = vector.broadcast %cst_12 : f32 to vector<8x128xf32>
    %52 = arith.mulf %51, %50 : vector<8x128xf32>
    %cst_13 = arith.constant 5.000000e-01 : f32
    %53 = vector.broadcast %cst_13 : f32 to vector<8x128xf32>
    %54 = arith.addf %52, %53 : vector<8x128xf32>
    %c0_14 = arith.constant 0 : index
    %c0_15 = arith.constant 0 : index
    %55 = vector.load %arg3[%c0_14, %c0_15] : memref<8x128xf32, #tpu.memory_space<vmem>>, vector<8x128xf32>
    tpu.vector_store %arg3[%c0_14, %c0_15], %54 {strides = array<i32>} : memref<8x128xf32, #tpu.memory_space<vmem>>, vector<8x128xf32>,
    return
  }
  func.func @transform_0(%arg0: i32) -> i32 {
    %c0_i32 = arith.constant 0 : i32
    %c0_i32_0 = arith.constant 0 : i32
    return %c0_i32 : i32
  }
  func.func @transform_1(%arg0: i32) -> (i32, i32, i32) {
    %c0_i32 = arith.constant 0 : i32
    %c0_i32_0 = arith.constant 0 : i32
    %c0_i32_1 = arith.constant 0 : i32
    return %c0_i32, %arg0, %c0_i32_0 : i32, i32, i32
  }
  func.func @transform_2(%arg0: i32) -> (i32, i32) {
    %c0_i32 = arith.constant 0 : i32
    %c0_i32_0 = arith.constant 0 : i32
    return %arg0, %c0_i32 : i32, i32
  }
}

</mosaic_0001>

<bundles_post_ra>
// kernel: tpu_custom_call.1
= control target key start
LH: loop header
LB: loop body
LE: loop exit
PB: predicated region body
PF: predicated region fallthrough
CT: control target
= control target key end

     0   :  { %7 = vsyncpa [#allocation5], 0  ;;  %s219_s0 = inlined_call_operand.hbm [shape: f32[9], index: 0, kind: input, shape index: {}]   ;;  %s220_s1 = inlined_call_operand.hbm [shape: f32[2,8,128], index: 1, kind: input, shape index: {}]   ;;  %s221_s2 = inlined_call_operand.hbm [shape: f32[8,128], index: 2, kind: output, shape index: {}]  }
   0x1   :  { %8 = vsyncpa [#allocation3], 0 }
   0x2   :  { %9 = vsyncpa [#allocation4], 0  ;;  %s15_s11 = sshll.u32 %s219_s0, 4  ;;  %s23_s14 = sshll.u32 %s220_s1, 4  ;;  %s16_s11 = int_to_ptr.hbm [resolvable:$true] %s15_s11  ;;  %s24_s14 = int_to_ptr.hbm [resolvable:$true] %s23_s14 }
   0x3   :  { %s190_s15 = smov [#allocation2]   ;;  %s191_s16 = smov [#allocation6]  }
   0x4   :  { %18 = dma.hbm_to_smem %s16_s11, 16, %s190_s15, [#allocation5]  }
   0x5   :  { %s25_s17 = sshll.u32 %s191_s16, 4  ;;  %s192_s18 = smov 128   ;;  %s26_s17 = int_to_ptr.vmem [resolvable:$true] %s25_s17 }
   0x6   :  { %s193_s19 = smov 8  }
   0x7   :  { %31 = dma.hbm_to_vmem [thread:$0]  %s24_s14, 256, %s26_s17, [#allocation3], %s192_s18, %s192_s18, %s193_s19  }
   0x8   :  { %184 = dma.done.wait [#allocation5], 16  }
   0x9   :  { %185 = vsyncadd [#allocation5], 4294967280 }
   0xa   :  { %186 = dma.done.wait [#allocation3], 256  }
   0xb   :  { %187 = vsyncadd [#allocation3], 4294967040 }
   0xc   :  { %40 = sfence }
   0xd   :  { %s44_s0 = sld [smem:[#allocation2]]  ;;  %v41_v0 = vld [vmem:[#allocation6] sm:$0xff]  ;;  %v43_v1 = vld [vmem:[#allocation6 + $0x8] sm:$0xff]  ;;  %s194_s27 = smov [#allocation7]  }
   0xe   :  { %s105_s20 = sld [smem:[#allocation2 + $0x1]]  ;;  %s92_s28 = sshll.u32 %s194_s27, 4  ;;  %s93_s28 = int_to_ptr.vmem [resolvable:$true] %s92_s28 }
   0xf   :  { %s106_s21 = sld [smem:[#allocation2 + $0x2]]  ;;  %s94_s3 = sshll.u32 %s221_s2, 4  ;;  %s95_s3 = int_to_ptr.hbm [resolvable:$true] %s94_s3 }
  0x10   :  { %s107_s22 = sld [smem:[#allocation2 + $0x3]] }
  0x11   :  { %s108_s1 = sld [smem:[#allocation2 + $0x4]] }
  0x12   :  { %s109_s23 = sld [smem:[#allocation2 + $0x5]] }
  0x13   :  { %v53_v2 = vstv %s44_s0  ;;  %s110_s24 = sld [smem:[#allocation2 + $0x6]] }
  0x14   :  { %v54_v3 = vmul.f32 %v53_v2, %v41_v0  ;;  %v55_v4 = vstv %s105_s20  ;;  %s111_s25 = sld [smem:[#allocation2 + $0x7]] }
  0x15   :  { %v56_v5 = vmul.f32 %v55_v4, %v43_v1  ;;  %v64_v6 = vstv %s106_s21  ;;  %s112_s26 = sld [smem:[#allocation2 + $0x8]] }
  0x16   :  { %v65_v7 = vmul.f32 %v64_v6, %v41_v0  ;;  %v66_v8 = vstv %s107_s22 }
  0x17   :  { %v57_v9 = vadd.f32 %v56_v5, %v54_v3  ;;  %v58_v10 = vstv %s108_s1  ;;  %v67_v11 = vmul.f32 %v66_v8, %v43_v1 }
  0x18   :  { %v69_v12 = vstv %s109_s23 }
  0x19   :  { %v59_v13 = vadd.f32 %v58_v10, %v57_v9  ;;  %v68_v14 = vadd.f32 %v67_v11, %v65_v7  ;;  %v75_v21 = vstv %s110_s24 }
  0x1a   :  { %v77_v24 = vstv %s111_s25 }
  0x1b   :  { %v60_v15 = vmul.f32 0.5, %v59_v13  ;;  %v70_v16 = vadd.f32 %v69_v12, %v68_v14  ;;  %v80_v28 = vstv %s112_s26 }
  0x1d   :  { %118 = vtanh.f32 %v60_v15  ;;  %v71_v17 = vmul.f32 0.5, %v70_v16 }
  0x1f   :  { %120 = vtanh.f32 %v71_v17 }
  0x23   :  { %v119_v18 = vpop.eup %118 }
  0x24   :  { %v62_v19 = vmul.f32 0.5, %v119_v18 }
  0x25   :  { %v121_v20 = vpop.eup %120 }
  0x26   :  { %v63_v22 = vadd.f32 0.5, %v62_v19  ;;  %v73_v23 = vmul.f32 0.5, %v121_v20 }
  0x28   :  { %v74_v25 = vadd.f32 0.5, %v73_v23  ;;  %v76_v26 = vmul.f32 %v75_v21, %v63_v22 }
  0x2a   :  { %v78_v27 = vmul.f32 %v77_v24, %v74_v25 }
  0x2c   :  { %v79_v29 = vadd.f32 %v78_v27, %v76_v26 }
  0x2e   :  { %v81_v30 = vadd.f32 %v80_v28, %v79_v29 }
  0x30   :  { %v82_v31 = vmul.f32 0.5, %v81_v30 }
  0x32   :  { %122 = vtanh.f32 %v82_v31 }
  0x38   :  { %v123_v32 = vpop.eup %122 }
  0x39   :  { %v84_v33 = vmul.f32 0.5, %v123_v32 }
  0x3b   :  { %v85_v34 = vadd.f32 0.5, %v84_v33 }
  0x3d   :  { %86 = vst [vmem:[#allocation7] sm:$0xff] %v85_v34 }
  0x3e   :  { %97 = dma.vmem_to_hbm [thread:$0]  %s93_s28, 128, %s95_s3, [#allocation4]  }
  0x3f   :  { %188 = dma.done.wait [#allocation4], 128  }
  0x40   :  { %189 = vsyncadd [#allocation4], 4294967168 }
  0x41   :  { %102 = vsyncpa [#allocation3], 1 }
  0x42   :  { %103 = vsyncpa [#allocation4], 1 }
  0x43   :  { %104 = vsyncpa [#allocation5], 1 }

</bundles_post_ra>
